<compile_context>
chip_gen: v7x
topology: tpu7x:2x2x1
jax: 0.10.0
libtpu: 0.0.40
codegen_flags: <defaults>
</compile_context>

<pallas_src>
import jax
import jax.numpy as jnp
from jax.experimental import pallas as pl
from jax.experimental.pallas import tpu as pltpu


def _round_up(x: int, m: int) -> int:
    return ((x + m - 1) // m) * m


def _cdiv(a: int, b: int) -> int:
    return (a + b - 1) // b


def _detect_platform():
    """1 TensorCore on v5e/v6e, 2 on v7x; per-generation tile/VMEM budget."""
    try:
        kind = jax.devices()[0].device_kind.lower()
    except Exception:
        kind = ""
    is_v7 = ("v7" in kind) or ("tpu7" in kind)
    n_cores = 2 if is_v7 else 1
    tb_max = 4096 if is_v7 else 8192          # v7x has 64 MiB VMEM, others 128
    vmem_limit = (48 << 20) if is_v7 else (64 << 20)
    return n_cores, tb_max, vmem_limit


N_CORES, TB_MAX, VMEM_LIMIT = _detect_platform()
L_PAD = 32          # padded line count (lane width of all per-line tensors)


def ploss_kernel(x_ref, wp_ref, wq_ref, wv_ref, r_ref, vmoff_ref, out_ref):
    i = pl.program_id(1)

    @pl.when(i == 0)
    def _init():
        out_ref[...] = jnp.zeros_like(out_ref)

    # Subtract the 1.0 pu baseline from the vm feature lanes (f32, before the
    # bf16 cast so the +-0.02 voltage deviation keeps full precision).
    x_adj = x_ref[...] - vmoff_ref[...]                 # (TB, 4*NB) f32
    xb = x_adj.astype(jnp.bfloat16)

    # Three small MXU matmuls against resident bf16 weights:
    #   W_p / W_q fold the load/gen masks into the PTDF (line P / Q flows),
    #   W_v folds the gen mask into the from-bus one-hot (voltage delta).
    pf = jnp.dot(xb, wp_ref[...], preferred_element_type=jnp.float32)   # (TB, L)
    qf = jnp.dot(xb, wq_ref[...], preferred_element_type=jnp.float32)   # (TB, L)
    dv = jnp.dot(xb, wv_ref[...], preferred_element_type=jnp.float32)   # (TB, L)
    vm_from = 1.0 + dv                  # padded lines/rows -> exactly 1.0, no guard

    # Per-line active loss surrogate for res_line.pl_mw: r * (P^2 + Q^2) / V^2.
    inv_v2 = pl.reciprocal(vm_from * vm_from, approx=True)              # EUP
    pl_line = r_ref[...] * (pf * pf + qf * qf) * inv_v2                 # (TB, L)

    # Lane-parallel partial sum: collapse the batch axis with pure VALU adds
    # into the resident (1, 8, L) accumulator; cross-lane reduce happens once
    # in the wrapper on the tiny partials array.
    l_pad = pl_line.shape[-1]
    part = jnp.sum(pl_line.reshape(-1, 8, l_pad), axis=0)               # (8, L)
    out_ref[...] += part[None, :, :]


def build_network(n_bus: int = 16, l_pad: int = L_PAD):
    """Deterministic synthetic grid (ring + chords) with DC-PTDF (glue code).

    All network constants are folded into three (4*n_bus, l_pad) bf16 weight
    matrices acting directly on the fused feature slab
        row = [p_load(n_bus) | q_load(n_bus) | p_gen(n_bus) | vm_y(n_bus)].
    Padded line columns are zero and have r=0, so they contribute nothing and
    their vm_from is exactly 1 (no NaN/Inf anywhere).
    """
    from_bus = list(range(n_bus)) + list(range(0, n_bus, 2))
    to_bus = [(i + 1) % n_bus for i in range(n_bus)] + \
             [(i + 4) % n_bus for i in range(0, n_bus, 2)]
    n_line = len(from_bus)
    assert n_line <= l_pad

    x_line = 0.05 + 0.01 * jnp.arange(n_line, dtype=jnp.float32) / n_line
    r_line = 0.01 + 0.004 * jnp.arange(n_line, dtype=jnp.float32) / n_line

    fb = jnp.array(from_bus, dtype=jnp.int32)
    tbus = jnp.array(to_bus, dtype=jnp.int32)
    lidx = jnp.arange(n_line)

    A = jnp.zeros((n_line, n_bus), jnp.float32)
    A = A.at[lidx, fb].set(1.0)
    A = A.at[lidx, tbus].add(-1.0)

    binv = 1.0 / x_line
    Bbus = A.T @ (binv[:, None] * A)
    Xred = jnp.linalg.inv(Bbus[1:, 1:])                 # bus 0 is slack
    Xfull = jnp.zeros((n_bus, n_bus), jnp.float32).at[1:, 1:].set(Xred)
    ptdf = (binv[:, None] * A) @ Xfull                  # (L, N)
    ptdf_T = ptdf.T                                     # (N, L)

    gen_buses = jnp.array([1, 5, 9, 13], dtype=jnp.int32)
    gen_mask = jnp.zeros((n_bus,), jnp.float32).at[gen_buses].set(1.0)
    load_mask = 1.0 - gen_mask

    feat = 4 * n_bus
    # W_p: P flow = -load_mask*p_load @ ptdf^T + gen_mask*p_gen @ ptdf^T
    w_p = jnp.zeros((feat, l_pad), jnp.float32)
    w_p = w_p.at[0:n_bus, :n_line].set(-(load_mask[:, None] * ptdf_T))
    w_p = w_p.at[2 * n_bus:3 * n_bus, :n_line].set(gen_mask[:, None] * ptdf_T)
    # W_q: Q flow = -load_mask*q_load @ ptdf^T
    w_q = jnp.zeros((feat, l_pad), jnp.float32)
    w_q = w_q.at[n_bus:2 * n_bus, :n_line].set(-(load_mask[:, None] * ptdf_T))
    # W_v: vm_from - 1 = (gen_mask*(vm_y - 1)) gathered through from-bus one-hot
    from_oh = jnp.zeros((n_bus, l_pad), jnp.float32).at[fb, lidx].set(1.0)
    w_v = jnp.zeros((feat, l_pad), jnp.float32)
    w_v = w_v.at[3 * n_bus:4 * n_bus, :].set(gen_mask[:, None] * from_oh)

    w_p = w_p.astype(jnp.bfloat16)
    w_q = w_q.astype(jnp.bfloat16)
    w_v = w_v.astype(jnp.bfloat16)                      # exact for 0/1 entries

    r_pad = jnp.zeros((1, l_pad), jnp.float32).at[0, :n_line].set(r_line)
    vm_off = jnp.zeros((1, feat), jnp.float32).at[0, 3 * n_bus:].set(1.0)
    return w_p, w_q, w_v, r_pad, vm_off


@jax.jit
def ploss_metric(X, y, w_p, w_q, w_v, r_line, vm_off):
    B, n_bus, _ = X.shape
    feat = 4 * n_bus
    l_pad = r_line.shape[1]

    # Tiles per core and tile size chosen so batch padding is <= 8 rows.
    npc = max(1, _cdiv(B, N_CORES * TB_MAX))
    tb = _round_up(_cdiv(B, N_CORES * npc), 8)
    b_pad = N_CORES * npc * tb

    # Fuse the four per-bus features into one lane-dense slab BEFORE padding
    # (small arrays first, no 128-lane zero padding streamed through HBM).
    xt = jnp.transpose(X, (0, 2, 1)).reshape(B, 3 * n_bus)   # [p | q | p_gen]
    slab = jnp.concatenate([xt, y[:, :, 0]], axis=1)         # (B, 4*n_bus)
    if b_pad > B:
        # Padded rows: zero load/gen, vm = 1.0 pu -> zero loss, finite voltage.
        pad_rows = jnp.concatenate(
            [jnp.zeros((b_pad - B, 3 * n_bus), slab.dtype),
             jnp.ones((b_pad - B, n_bus), slab.dtype)], axis=1)
        slab = jnp.concatenate([slab, pad_rows], axis=0)

    x_spec = pl.BlockSpec((tb, feat), lambda c, i: (c * npc + i, 0))
    w_spec = pl.BlockSpec((feat, l_pad), lambda c, i: (0, 0))
    r_spec = pl.BlockSpec((1, l_pad), lambda c, i: (0, 0))
    off_spec = pl.BlockSpec((1, feat), lambda c, i: (0, 0))
    out_spec = pl.BlockSpec((1, 8, l_pad), lambda c, i: (c, 0, 0))

    flops = b_pad * (3 * 2 * feat * l_pad + 10 * l_pad + feat)
    bytes_accessed = (b_pad * feat * 4 + 3 * feat * l_pad * 2
                      + (l_pad + feat) * 4 + N_CORES * 8 * l_pad * 4)

    partials = pl.pallas_call(
        ploss_kernel,
        out_shape=jax.ShapeDtypeStruct((N_CORES, 8, l_pad), jnp.float32),
        grid=(N_CORES, npc),
        in_specs=[x_spec, w_spec, w_spec, w_spec, r_spec, off_spec],
        out_specs=out_spec,
        compiler_params=pltpu.CompilerParams(
            dimension_semantics=("parallel", "arbitrary"),
            vmem_limit_bytes=VMEM_LIMIT),
        cost_estimate=pl.CostEstimate(flops=flops,
                                      transcendentals=b_pad * l_pad,
                                      bytes_accessed=bytes_accessed),
    )(slab, w_p, w_q, w_v, r_line, vm_off)

    # TODO(synk): pandapower's convergence try/except (divide by `converged`,
    # return -1 if none converge) has no Pallas equivalent; the linearized
    # surrogate always "converges", so we divide by the full batch size.
    return jnp.sum(partials) / float(B)


if __name__ == "__main__":
    B, N_BUS = 2, 16
    key = jax.random.PRNGKey(0)
    kx, ky = jax.random.split(key)
    # X[..., 0]=load p_mw, X[..., 1]=load q_mvar, X[..., 2]=gen p_mw
    X = jnp.abs(jax.random.normal(kx, (B, N_BUS, 3), dtype=jnp.float32))
    # y[..., 0]=gen vm_pu (around 1.0)
    y = 1.0 + 0.02 * jax.random.normal(ky, (B, N_BUS, 1), dtype=jnp.float32)

    w_p, w_q, w_v, r_line, vm_off = build_network(N_BUS)

    loss = ploss_metric(X, y, w_p, w_q, w_v, r_line, vm_off)
    jax.block_until_ready(loss)
    assert jnp.isfinite(loss), loss
    print("KERNEL_OK")
</pallas_src>

<mosaic_0001>
module attributes {stable_mosaic.version = 11 : i64} {
  func.func @ploss_kernel(%arg0: i32, %arg1: i32, %arg2: memref<8x64xf32, #tpu.memory_space<vmem>>, %arg3: memref<64x32xbf16, #tpu.memory_space<vmem>>, %arg4: memref<64x32xbf16, #tpu.memory_space<vmem>>, %arg5: memref<64x32xbf16, #tpu.memory_space<vmem>>, %arg6: memref<1x32xf32, #tpu.memory_space<vmem>>, %arg7: memref<1x64xf32, #tpu.memory_space<vmem>>, %arg8: memref<1x8x32xf32, #tpu.memory_space<vmem>>) attributes {dimension_semantics = [#tpu.dimension_semantics<parallel>, #tpu.dimension_semantics<arbitrary>], iteration_bounds = array<i64: 1, 1>, scalar_prefetch = 0 : i64, scratch_operands = 0 : i64, tpu.core_type = #tpu.core_type<tc>, window_params = [{transform_indices = @transform_0, window_bounds = array<i64: 8, 64>}, {pipeline_mode = #tpu.pipeline_mode<synchronous>, transform_indices = @transform_1, window_bounds = array<i64: 64, 32>}, {pipeline_mode = #tpu.pipeline_mode<synchronous>, transform_indices = @transform_2, window_bounds = array<i64: 64, 32>}, {pipeline_mode = #tpu.pipeline_mode<synchronous>, transform_indices = @transform_3, window_bounds = array<i64: 64, 32>}, {pipeline_mode = #tpu.pipeline_mode<synchronous>, transform_indices = @transform_4, window_bounds = array<i64: 1, 32>}, {pipeline_mode = #tpu.pipeline_mode<synchronous>, transform_indices = @transform_5, window_bounds = array<i64: 1, 64>}, {transform_indices = @transform_6, window_bounds = array<i64: 1, 8, 32>}]} {
    %c0_i32 = arith.constant 0 : i32
    %0 = arith.cmpi eq, %arg1, %c0_i32 : i32
    %1 = arith.extui %0 : i1 to i32
    %c0_i32_0 = arith.constant 0 : i32
    %2 = arith.cmpi ne, %1, %c0_i32_0 : i32
    scf.if %2 {
      %cst_22 = arith.constant 0.000000e+00 : f32
      %31 = vector.broadcast %cst_22 : f32 to vector<1x8x32xf32>
      %c0_23 = arith.constant 0 : index
      %c0_24 = arith.constant 0 : index
      %c0_25 = arith.constant 0 : index
      %32 = vector.load %arg8[%c0_23, %c0_24, %c0_25] : memref<1x8x32xf32, #tpu.memory_space<vmem>>, vector<1x8x32xf32>
      tpu.vector_store %arg8[%c0_23, %c0_24, %c0_25], %31 {strides = array<i32>} : memref<1x8x32xf32, #tpu.memory_space<vmem>>, vector<1x8x32xf32>,
    } else {
    }
    %c0 = arith.constant 0 : index
    %c0_1 = arith.constant 0 : index
    %3 = vector.load %arg2[%c0, %c0_1] : memref<8x64xf32, #tpu.memory_space<vmem>>, vector<8x64xf32>
    %c0_2 = arith.constant 0 : index
    %c0_3 = arith.constant 0 : index
    %4 = vector.load %arg7[%c0_2, %c0_3] : memref<1x64xf32, #tpu.memory_space<vmem>>, vector<1x64xf32>
    %5 = vector.broadcast %4 : vector<1x64xf32> to vector<8x64xf32>
    %6 = arith.subf %3, %5 : vector<8x64xf32>
    %7 = arith.truncf %6 : vector<8x64xf32> to vector<8x64xbf16>
    %c0_4 = arith.constant 0 : index
    %c0_5 = arith.constant 0 : index
    %8 = vector.load %arg3[%c0_4, %c0_5] : memref<64x32xbf16, #tpu.memory_space<vmem>>, vector<64x32xbf16>
    %cst = arith.constant dense<0.000000e+00> : vector<8x32xf32>
    %9 = tpu.matmul %7, %8, %cst {dimension_numbers = #tpu.dot_dimension_numbers<[1], [0], [0], [1], [0, 0, 1, 1], [], []>} : vector<8x64xbf16>, vector<64x32xbf16>, vector<8x32xf32> -> vector<8x32xf32>
    %c0_6 = arith.constant 0 : index
    %c0_7 = arith.constant 0 : index
    %10 = vector.load %arg4[%c0_6, %c0_7] : memref<64x32xbf16, #tpu.memory_space<vmem>>, vector<64x32xbf16>
    %cst_8 = arith.constant dense<0.000000e+00> : vector<8x32xf32>
    %11 = tpu.matmul %7, %10, %cst_8 {dimension_numbers = #tpu.dot_dimension_numbers<[1], [0], [0], [1], [0, 0, 1, 1], [], []>} : vector<8x64xbf16>, vector<64x32xbf16>, vector<8x32xf32> -> vector<8x32xf32>
    %c0_9 = arith.constant 0 : index
    %c0_10 = arith.constant 0 : index
    %12 = vector.load %arg5[%c0_9, %c0_10] : memref<64x32xbf16, #tpu.memory_space<vmem>>, vector<64x32xbf16>
    %cst_11 = arith.constant dense<0.000000e+00> : vector<8x32xf32>
    %13 = tpu.matmul %7, %12, %cst_11 {dimension_numbers = #tpu.dot_dimension_numbers<[1], [0], [0], [1], [0, 0, 1, 1], [], []>} : vector<8x64xbf16>, vector<64x32xbf16>, vector<8x32xf32> -> vector<8x32xf32>
    %cst_12 = arith.constant 1.000000e+00 : f32
    %14 = vector.broadcast %cst_12 : f32 to vector<8x32xf32>
    %15 = arith.addf %14, %13 : vector<8x32xf32>
    %16 = arith.mulf %15, %15 : vector<8x32xf32>
    %17 = tpu.reciprocal %16 {approx = true} : vector<8x32xf32> -> vector<8x32xf32>
    %c0_13 = arith.constant 0 : index
    %c0_14 = arith.constant 0 : index
    %18 = vector.load %arg6[%c0_13, %c0_14] : memref<1x32xf32, #tpu.memory_space<vmem>>, vector<1x32xf32>
    %19 = arith.mulf %9, %9 : vector<8x32xf32>
    %20 = arith.mulf %11, %11 : vector<8x32xf32>
    %21 = arith.addf %19, %20 : vector<8x32xf32>
    %22 = vector.broadcast %18 : vector<1x32xf32> to vector<8x32xf32>
    %23 = arith.mulf %22, %21 : vector<8x32xf32>
    %24 = arith.mulf %23, %17 : vector<8x32xf32>
    %25 = vector.shape_cast %24 : vector<8x32xf32> to vector<1x8x32xf32>
    %cst_15 = arith.constant dense<0.000000e+00> : vector<8x32xf32>
    %26 = vector.multi_reduction <add>, %25, %cst_15 [0] : vector<1x8x32xf32> to vector<8x32xf32>
    %c0_16 = arith.constant 0 : index
    %c0_17 = arith.constant 0 : index
    %c0_18 = arith.constant 0 : index
    %27 = vector.load %arg8[%c0_16, %c0_17, %c0_18] : memref<1x8x32xf32, #tpu.memory_space<vmem>>, vector<1x8x32xf32>
    %28 = vector.shape_cast %26 : vector<8x32xf32> to vector<1x8x32xf32>
    %29 = arith.addf %27, %28 : vector<1x8x32xf32>
    %c0_19 = arith.constant 0 : index
    %c0_20 = arith.constant 0 : index
    %c0_21 = arith.constant 0 : index
    %30 = vector.load %arg8[%c0_19, %c0_20, %c0_21] : memref<1x8x32xf32, #tpu.memory_space<vmem>>, vector<1x8x32xf32>
    tpu.vector_store %arg8[%c0_19, %c0_20, %c0_21], %29 {strides = array<i32>} : memref<1x8x32xf32, #tpu.memory_space<vmem>>, vector<1x8x32xf32>,
    return
  }
  func.func @transform_0(%arg0: i32, %arg1: i32) -> (i32, i32) {
    %c1_i32 = arith.constant 1 : i32
    %0 = arith.muli %arg0, %c1_i32 : i32
    %1 = arith.addi %0, %arg1 : i32
    %c0_i32 = arith.constant 0 : i32
    %c0_i32_0 = arith.constant 0 : i32
    return %1, %c0_i32 : i32, i32
  }
  func.func @transform_1(%arg0: i32, %arg1: i32) -> (i32, i32) {
    %c0_i32 = arith.constant 0 : i32
    %c0_i32_0 = arith.constant 0 : i32
    %c0_i32_1 = arith.constant 0 : i32
    return %c0_i32, %c0_i32_0 : i32, i32
  }
  func.func @transform_2(%arg0: i32, %arg1: i32) -> (i32, i32) {
    %c0_i32 = arith.constant 0 : i32
    %c0_i32_0 = arith.constant 0 : i32
    %c0_i32_1 = arith.constant 0 : i32
    return %c0_i32, %c0_i32_0 : i32, i32
  }
  func.func @transform_3(%arg0: i32, %arg1: i32) -> (i32, i32) {
    %c0_i32 = arith.constant 0 : i32
    %c0_i32_0 = arith.constant 0 : i32
    %c0_i32_1 = arith.constant 0 : i32
    return %c0_i32, %c0_i32_0 : i32, i32
  }
  func.func @transform_4(%arg0: i32, %arg1: i32) -> (i32, i32) {
    %c0_i32 = arith.constant 0 : i32
    %c0_i32_0 = arith.constant 0 : i32
    %c0_i32_1 = arith.constant 0 : i32
    return %c0_i32, %c0_i32_0 : i32, i32
  }
  func.func @transform_5(%arg0: i32, %arg1: i32) -> (i32, i32) {
    %c0_i32 = arith.constant 0 : i32
    %c0_i32_0 = arith.constant 0 : i32
    %c0_i32_1 = arith.constant 0 : i32
    return %c0_i32, %c0_i32_0 : i32, i32
  }
  func.func @transform_6(%arg0: i32, %arg1: i32) -> (i32, i32, i32) {
    %c0_i32 = arith.constant 0 : i32
    %c0_i32_0 = arith.constant 0 : i32
    %c0_i32_1 = arith.constant 0 : i32
    return %arg0, %c0_i32, %c0_i32_0 : i32, i32, i32
  }
}

</mosaic_0001>

<bundles_post_ra>
// kernel: ploss_metric.1
= control target key start
LH: loop header
LB: loop body
LE: loop exit
PB: predicated region body
PF: predicated region fallthrough
CT: control target
= control target key end

     0   :  { %11 = vsyncpa [#allocation3], 0  ;;  %s782_s0 = inlined_call_operand.hbm [shape: f32[8,64], index: 0, kind: input, shape index: {}]   ;;  %s783_s1 = inlined_call_operand.hbm [shape: bf16[64,32], index: 1, kind: input, shape index: {}]   ;;  %s784_s2 = inlined_call_operand.hbm [shape: bf16[64,32], index: 2, kind: input, shape index: {}]   ;;  %s785_s3 = inlined_call_operand.hbm [shape: bf16[64,32], index: 3, kind: input, shape index: {}]   ;;  %s786_s4 = inlined_call_operand.hbm [shape: f32[1,32], index: 4, kind: input, shape index: {}]   ;;  %s787_s5 = inlined_call_operand.hbm [shape: f32[1,64], index: 5, kind: input, shape index: {}]   ;;  %s788_s6 = inlined_call_operand.hbm [shape: f32[1,8,32], index: 6, kind: output, shape index: {}]  }
   0x1   :  { %12 = vsyncpa [#allocation6], 0 }
   0x2   :  { %13 = vsyncpa [#allocation9], 0 }
   0x3   :  { %14 = vsyncpa [#allocation12], 0 }
   0x4   :  { %15 = vsyncpa [#allocation4], 0  ;;  %s635_s21 = smov [#allocation5]   ;;  %s471_s25 = scalar_lea.hbm %s783_s1, 512 }
   0x5   :  { %s34_s22 = sshll.u32 %s635_s21, 4  ;;  %p472_p0 = scmp.ne.s32.totalorder %s783_s1, %s471_s25  ;;  %s35_s22 = int_to_ptr.vmem [resolvable:$true] %s34_s22 }
   0x6   :  { %p475_p1 = scmp.lt.u32.totalorder %s471_s25, %s783_s1 }
   0x8   :  { %p477_p2 = pnand %p475_p1, %p472_p0 }
   0xa   :  { %480 = shalt.err (!%p477_p2)
}
   0xb   :  { %s481_s30 = scalar_lea.vmem %s35_s22, 512  ;;  %p486_p4 = scmp.lt.s32.totalorder %s35_s22, %s35_s22 }
   0xc   :  { %p482_p3 = scmp.ne.s32.totalorder %s35_s22, %s481_s30  ;;  %p487_p5 = scmp.lt.s32.totalorder %s481_s30, %s481_s30 }
   0xe   :  { %p488_p6 = por %p487_p5, %p486_p4 }
  0x10   :  { %p489_p7 = pnand %p488_p6, %p482_p3 }
  0x12   :  { %492 = shalt.err (!%p489_p7)
}
  0x13   :  { %s636_s7 = smov 64   ;;  %s637_s8 = smov 4  }
  0x14   :  { %40 = dma.hbm_to_vmem [thread:$0]  %s783_s1, 512, %s35_s22, [#allocation6], %s636_s7, %s636_s7, %s637_s8  }
  0x15   :  { %s638_s11 = smov [#allocation8]   ;;  %s639_s13 = smov [#allocation2]  }
  0x16   :  { %s58_s12 = sshll.u32 %s638_s11, 4  ;;  %s25_s14 = sshll.u32 %s639_s13, 4  ;;  %s59_s12 = int_to_ptr.vmem [resolvable:$true] %s58_s12  ;;  %s26_s14 = int_to_ptr.vmem [resolvable:$true] %s25_s14 }
  0x17   :  { %s493_s17 = scalar_lea.hbm %s785_s3, 512 }
  0x18   :  { %p494_p8 = scmp.ne.s32.totalorder %s785_s3, %s493_s17  ;;  %p497_p9 = scmp.lt.u32.totalorder %s493_s17, %s785_s3 }
  0x1a   :  { %p499_p10 = pnand %p497_p9, %p494_p8 }
  0x1c   :  { %502 = shalt.err (!%p499_p10)
}
  0x1d   :  { %s503_s1 = scalar_lea.vmem %s59_s12, 512  ;;  %p508_p12 = scmp.lt.s32.totalorder %s59_s12, %s59_s12 }
  0x1e   :  { %p504_p11 = scmp.ne.s32.totalorder %s59_s12, %s503_s1  ;;  %p509_p13 = scmp.lt.s32.totalorder %s503_s1, %s503_s1 }
  0x20   :  { %p510_p0 = por %p509_p13, %p508_p12 }
  0x22   :  { %p511_p1 = pnand %p510_p0, %p504_p11 }
  0x24   :  { %514 = shalt.err (!%p511_p1)
}
  0x25   :  { %64 = dma.hbm_to_vmem [thread:$0]  %s785_s3, 512, %s59_s12, [#allocation9], %s636_s7, %s636_s7, %s637_s8  }
  0x26   :  { %s515_s26 = scalar_lea.hbm %s782_s0, 128 }
  0x27   :  { %p516_p2 = scmp.ne.s32.totalorder %s782_s0, %s515_s26  ;;  %p519_p3 = scmp.lt.u32.totalorder %s515_s26, %s782_s0 }
  0x29   :  { %p521_p4 = pnand %p519_p3, %p516_p2 }
  0x2b   :  { %524 = shalt.err (!%p521_p4)
}
  0x2c   :  { %s525_s9 = scalar_lea.vmem %s26_s14, 128  ;;  %p530_p6 = scmp.lt.s32.totalorder %s26_s14, %s26_s14 }
  0x2d   :  { %p526_p5 = scmp.ne.s32.totalorder %s26_s14, %s525_s9  ;;  %p531_p7 = scmp.lt.s32.totalorder %s525_s9, %s525_s9 }
  0x2f   :  { %p532_p8 = por %p531_p7, %p530_p6 }
  0x31   :  { %p533_p9 = pnand %p532_p8, %p526_p5 }
  0x33   :  { %536 = shalt.err (!%p533_p9)
}
  0x34   :  { %28 = dma.hbm_to_vmem [thread:$0]  %s782_s0, 128, %s26_s14, [#allocation3]  }
  0x35   :  { %s640_s11 = smov [#allocation7]   ;;  %s641_s13 = smov [#allocation10]  }
  0x36   :  { %s46_s12 = sshll.u32 %s640_s11, 4  ;;  %s71_s15 = sshll.u32 %s641_s13, 4  ;;  %s47_s12 = int_to_ptr.vmem [resolvable:$true] %s46_s12  ;;  %s72_s15 = int_to_ptr.vmem [resolvable:$true] %s71_s15 }
  0x37   :  { %s537_s18 = scalar_lea.hbm %s784_s2, 512 }
  0x38   :  { %p538_p10 = scmp.ne.s32.totalorder %s784_s2, %s537_s18  ;;  %p541_p11 = scmp.lt.u32.totalorder %s537_s18, %s784_s2 }
  0x3a   :  { %p543_p12 = pnand %p541_p11, %p538_p10 }
  0x3c   :  { %546 = shalt.err (!%p543_p12)
}
  0x3d   :  { %s547_s0 = scalar_lea.vmem %s47_s12, 512  ;;  %p552_p0 = scmp.lt.s32.totalorder %s47_s12, %s47_s12 }
  0x3e   :  { %p548_p13 = scmp.ne.s32.totalorder %s47_s12, %s547_s0  ;;  %p553_p1 = scmp.lt.s32.totalorder %s547_s0, %s547_s0 }
  0x40   :  { %p554_p2 = por %p553_p1, %p552_p0 }
  0x42   :  { %p555_p3 = pnand %p554_p2, %p548_p13 }
  0x44   :  { %558 = shalt.err (!%p555_p3)
}
  0x45   :  { %52 = dma.hbm_to_vmem [thread:$0]  %s784_s2, 512, %s47_s12, [#allocation6], %s636_s7, %s636_s7, %s637_s8  }
  0x46   :  { %s559_s25 = scalar_lea.hbm %s786_s4, 16 }
  0x47   :  { %p560_p4 = scmp.ne.s32.totalorder %s786_s4, %s559_s25  ;;  %p563_p5 = scmp.lt.u32.totalorder %s559_s25, %s786_s4 }
  0x49   :  { %p565_p6 = pnand %p563_p5, %p560_p4 }
  0x4b   :  { %568 = shalt.err (!%p565_p6)
}
  0x4c   :  { %s569_s30 = scalar_lea.vmem %s72_s15, 16  ;;  %s573_s9 = scalar_lea.vmem %s72_s15, 32 }
  0x4d   :  { %p570_p7 = scmp.ne.s32.totalorder %s72_s15, %s569_s30  ;;  %p574_p8 = scmp.lt.s32.totalorder %s72_s15, %s72_s15 }
  0x4e   :  { %p575_p9 = scmp.lt.s32.totalorder %s573_s9, %s569_s30 }
  0x50   :  { %p576_p10 = por %p575_p9, %p574_p8 }
  0x52   :  { %p577_p11 = pnand %p576_p10, %p570_p7 }
  0x54   :  { %580 = shalt.err (!%p577_p11)
}
  0x55   :  { %74 = dma.hbm_to_vmem [thread:$0]  %s786_s4, 16, %s72_s15, [#allocation9]  }
  0x56   :  { %s642_s8 = smov [#allocation11]   ;;  %s581_s12 = scalar_lea.hbm %s787_s5, 16 }
  0x57   :  { %s81_s3 = sshll.u32 %s642_s8, 4  ;;  %p582_p12 = scmp.ne.s32.totalorder %s787_s5, %s581_s12  ;;  %s82_s3 = int_to_ptr.vmem [resolvable:$true] %s81_s3 }
  0x58   :  { %p585_p13 = scmp.lt.u32.totalorder %s581_s12, %s787_s5 }
  0x5a   :  { %p587_p0 = pnand %p585_p13, %p582_p12 }
  0x5c   :  { %590 = shalt.err (!%p587_p0)
}
  0x5d   :  { %s591_s19 = scalar_lea.vmem %s82_s3, 16  ;;  %s595_s4 = scalar_lea.vmem %s82_s3, 32 }
  0x5e   :  { %p592_p1 = scmp.ne.s32.totalorder %s82_s3, %s591_s19  ;;  %p596_p2 = scmp.lt.s32.totalorder %s82_s3, %s82_s3 }
  0x5f   :  { %p597_p3 = scmp.lt.s32.totalorder %s595_s4, %s591_s19 }
  0x61   :  { %p598_p4 = por %p597_p3, %p596_p2 }
  0x63   :  { %p599_p5 = pnand %p598_p4, %p592_p1 }
  0x65   :  { %602 = shalt.err (!%p599_p5)
}
  0x66   :  { %84 = dma.hbm_to_vmem [thread:$0]  %s787_s5, 16, %s82_s3, [#allocation12]  }
  0x67   :  { %625 = dma.done.wait [#allocation3], 128  }
  0x68   :  { %626 = vsyncadd [#allocation3], 4294967168 }
  0x69   :  { %627 = dma.done.wait [#allocation6], 1024  }
  0x6a   :  { %628 = vsyncadd [#allocation6], 4294966272 }
  0x6b   :  { %629 = dma.done.wait [#allocation9], 528  }
  0x6c   :  { %630 = vsyncadd [#allocation9], 4294966768 }
  0x6d   :  { %631 = dma.done.wait [#allocation12], 16  }
  0x6e   :  { %632 = vsyncadd [#allocation12], 4294967280  ;;  %v643_v0 = vmov 0.0   ;;  %vm644_vm0 = vmmov 0   ;;  %v457_v1 = vld [vmem:[#allocation5] sm:$0xff]   ;;  %v459_v3 = vld [vmem:[#allocation5 + $0x8] sm:$0xff]  }
  0x6f   :  { %410 = vmatprep.subr.bf16.mxu0 %v643_v0  ;;  %422 = vmatprep.subr.bf16.mxu1 %v643_v0  ;;  %v458_v2 = vld [vmem:[#allocation7] sm:$0xff]   ;;  %v460_v4 = vld [vmem:[#allocation7 + $0x8] sm:$0xff]   ;;  %v461_v5 = vld [vmem:[#allocation5 + $0x10] sm:$0xff]   ;;  %vm153_vm1 = vcmask 523264   ;;  %vm109_vm2 = vcmask 261120   ;;  %s645_s5 = smov [#allocation13]  }
  0x70   :  { %418 = vmatprep.mubr.msk.bf16.mxu0 %vm644_vm0, %v643_v0  ;;  %430 = vmatprep.mubr.msk.bf16.mxu1 %vm644_vm0, %v643_v0  ;;  %v462_v6 = vld [vmem:[#allocation7 + $0x10] sm:$0xff]   ;;  %v111_v7 = vld [vmem:[#allocation2] sm:$0xff]  ;;  %v378_v8 = vld [vmem:[#allocation11] ss:$0 sm:$0xff]  ;;  %110 = vst.msk [vmem:[#allocation13] sm:$0xff] %vm109_vm2, %v643_v0  ;;  %s366_s21 = sshll.u32 %s645_s5, 4  ;;  %s367_s21 = int_to_ptr.vmem [resolvable:$true] %s366_s21 }
  0x71   :  { %411 = vmatpush3.bf16.msra.mxu0 %v457_v1  ;;  %423 = vmatpush3.bf16.msra.mxu1 %v458_v2  ;;  %v119_v9 = vsub.f32 %v111_v7, %v378_v8  ;;  %v463_v10 = vld [vmem:[#allocation5 + $0x18] sm:$0xff]   ;;  %v465_v13 = vld [vmem:[#allocation8] sm:$0xff]   ;;  %v466_v14 = vld [vmem:[#allocation8 + $0x8] sm:$0xff]   ;;  %s603_s1 = scalar_lea.vmem %s367_s21, 128  ;;  %p608_p7 = scmp.lt.s32.totalorder %s367_s21, %s367_s21 }
  0x72   :  { %412 = vmatprep.subr.bf16.mxu0 %v643_v0  ;;  %424 = vmatprep.subr.bf16.mxu1 %v643_v0  ;;  %v464_v11 = vld [vmem:[#allocation7 + $0x18] sm:$0xff]   ;;  %v467_v15 = vld [vmem:[#allocation8 + $0x10] sm:$0xff]   ;;  %v394_v34 = vld [vmem:[#allocation10] ss:$0 sm:$0xff]  ;;  %p604_p6 = scmp.ne.s32.totalorder %s367_s21, %s603_s1  ;;  %p609_p8 = scmp.lt.s32.totalorder %s603_s1, %s603_s1 }
  0x73   :  { %v120_v12 = vpack.c.bf16 %v119_v9, %v119_v9  ;;  %v468_v16 = vld [vmem:[#allocation8 + $0x18] sm:$0xff]  }
  0x74   :  { %p610_p9 = por %p609_p8, %p608_p7 }
  0x75   :  { %413 = vmatpush3.bf16.msra.mxu0 %v459_v3  ;;  %425 = vmatpush3.bf16.msra.mxu1 %v460_v4 }
  0x76   :  { %414 = vmatprep.subr.bf16.mxu0 %v643_v0  ;;  %426 = vmatprep.subr.bf16.mxu1 %v643_v0  ;;  %p611_p10 = pnand %p610_p9, %p604_p6 }
  0x77   :  { %v356_v37 = vld [vmem:[#allocation13] sm:$0xff] }
  0x79   :  { %415 = vmatpush3.bf16.msra.mxu0 %v461_v5  ;;  %427 = vmatpush3.bf16.msra.mxu1 %v462_v6 }
  0x7a   :  { %416 = vmatprep.subr.bf16.mxu0 %v643_v0  ;;  %428 = vmatprep.subr.bf16.mxu1 %v643_v0 }
  0x7d   :  { %417 = vmatpush3.bf16.msra.mxu0 %v463_v10  ;;  %429 = vmatpush3.bf16.msra.mxu1 %v464_v11 }
  0x7e   :  { %434 = vmatprep.subr.bf16.mxu0 %v643_v0 }
  0x80   :  { %419 = vmatmul.mubr.msk.bf16.vlgmr.msra.gmra.mrb[0].mxu0 %vm153_vm1, %v120_v12  ;;  %431 = vmatmul.mubr.msk.bf16.vlgmr.msra.gmra.mrb[0].mxu1 %vm153_vm1, %v120_v12 }
  0x81   :  { %435 = vmatpush3.bf16.msra.mxu0 %v465_v13  ;;  %442 = vmatprep.mubr.msk.bf16.mxu0 %vm644_vm0, %v643_v0 }
  0x82   :  { %436 = vmatprep.subr.bf16.mxu0 %v643_v0 }
  0x85   :  { %437 = vmatpush3.bf16.msra.mxu0 %v466_v14 }
  0x86   :  { %438 = vmatprep.subr.bf16.mxu0 %v643_v0 }
  0x89   :  { %439 = vmatpush3.bf16.msra.mxu0 %v467_v15 }
  0x8a   :  { %440 = vmatprep.subr.bf16.mxu0 %v643_v0 }
  0x8d   :  { %441 = vmatpush3.bf16.msra.mxu0 %v468_v16 }
  0x90   :  { %443 = vmatmul.mubr.msk.bf16.vlgmr.msra.gmra.mrb[4].mxu0 %vm153_vm1, %v120_v12 }
 0x153   :  { %v191_v17 = vpop.f32.mrb[0].mxu0  ;;  %v263_v20 = vpop.f32.mrb[0].mxu1 }
 0x154   :  { %v344_v18 = vmul.f32 %v191_v17, %v191_v17  ;;  %v420_v19 = vpop.f32.mrb[1].mxu0  ;;  %v345_v21 = vmul.f32 %v263_v20, %v263_v20  ;;  %v432_v23 = vpop.f32.mrb[1].mxu1 }
 0x155   :  { %v194_v22 = vpop.f32.mrb[2].mxu0  ;;  %v266_v25 = vpop.f32.mrb[2].mxu1 }
 0x156   :  { %v421_v24 = vpop.f32.mrb[3].mxu0  ;;  %v346_v26 = vadd.f32 %v345_v21, %v344_v18  ;;  %v433_v27 = vpop.f32.mrb[3].mxu1 }
 0x158   :  { %v353_v35 = vmul.f32 %v394_v34, %v346_v26 }
 0x163   :  { %v335_v28 = vpop.f32.mrb[4].mxu0 }
 0x164   :  { %v336_v29 = vadd.f32 1.0, %v335_v28  ;;  %v444_v30 = vpop.f32.mrb[5].mxu0 }
 0x165   :  { %v338_v31 = vpop.f32.mrb[6].mxu0 }
 0x166   :  { %v341_v32 = vmul.f32 %v336_v29, %v336_v29  ;;  %v445_v33 = vpop.f32.mrb[7].mxu0 }
 0x168   :  { %469 = vrcp.f32 %v341_v32 }
 0x172   :  { %v470_v36 = vpop.eup %469 }
 0x173   :  { %v354_v38 = vmul.f32 %v470_v36, %v353_v35 }
 0x175   :  { %v357_v39 = vadd.f32 %v356_v37, %v354_v38 }
 0x177   :  { %359 = vst.msk [vmem:[#allocation13] sm:$0xff] %vm109_vm2, %v357_v39 }
 0x178   :  { %614 = shalt.err (!%p611_p10)
}
 0x179   :  { %s615_s22 = scalar_lea.hbm %s788_s6, 128 }
 0x17a   :  { %p616_p11 = scmp.ne.s32.totalorder %s788_s6, %s615_s22  ;;  %p619_p12 = scmp.lt.u32.totalorder %s615_s22, %s788_s6 }
 0x17c   :  { %p621_p13 = pnand %p619_p12, %p616_p11 }
 0x17e   :  { %624 = shalt.err (!%p621_p13)
}
 0x17f   :  { %369 = dma.vmem_to_hbm [thread:$0]  %s367_s21, 128, %s788_s6, [#allocation4]  }
 0x180   :  { %633 = dma.done.wait [#allocation4], 128  }
 0x181   :  { %634 = vsyncadd [#allocation4], 4294967168 }
 0x182   :  { %373 = vsyncpa [#allocation3], 1 }
 0x183   :  { %374 = vsyncpa [#allocation6], 1 }
 0x184   :  { %375 = vsyncpa [#allocation9], 1 }
 0x185   :  { %376 = vsyncpa [#allocation12], 1 }
 0x186   :  { %377 = vsyncpa [#allocation4], 1 }

</bundles_post_ra>
